<compile_context>
chip_gen: v7x
topology: tpu7x:2x2x1
jax: 0.10.0
libtpu: 0.0.40
codegen_flags: <defaults>
</compile_context>

<pallas_src>
import jax
import jax.numpy as jnp
from jax import lax
from jax.experimental import pallas as pl
from jax.experimental.pallas import tpu as pltpu

EPS = 1e-5


# ---------------------------------------------------------------------------
# Kernel 1: fused softmax re-weighting
#   out = (x1*e1 + x2*e2 + x3*e3) / (e1 + e2 + e3),  e_i = exp(x_i)
# ---------------------------------------------------------------------------
def _weighted_sum_kernel(x1_ref, x2_ref, x3_ref, o_ref):
    a = x1_ref[...].astype(jnp.float32)
    b = x2_ref[...].astype(jnp.float32)
    c = x3_ref[...].astype(jnp.float32)
    ea, eb, ec = jnp.exp(a), jnp.exp(b), jnp.exp(c)          # EUP slot
    inv = pl.reciprocal(ea + eb + ec, approx=False)
    o_ref[...] = ((a * ea + b * eb + c * ec) * inv).astype(o_ref.dtype)


def fusion_weighted_sum(x1, x2, x3, *, lane=512, max_rows_per_tile=256):
    """Fused element-wise re-weighting over equal-shape inputs of any shape."""
    orig_shape, dtype = x1.shape, x1.dtype
    n = int(x1.size)
    rows = (n + lane - 1) // lane
    rows8 = ((rows + 7) // 8) * 8                 # sublane multiple
    tm = min(max_rows_per_tile, rows8)            # rows per tile (multiple of 8)
    grid_rows = (rows8 + tm - 1) // tm
    rows_pad = grid_rows * tm
    n_pad = rows_pad * lane

    def prep(x):
        xf = x.reshape(-1)
        if n_pad != n:
            xf = jnp.pad(xf, (0, n_pad - n))      # padded tail: all-zero -> output 0
        return xf.reshape(rows_pad, lane)

    out = pl.pallas_call(
        _weighted_sum_kernel,
        out_shape=jax.ShapeDtypeStruct((rows_pad, lane), dtype),
        grid=(grid_rows,),
        in_specs=[pl.BlockSpec((tm, lane), lambda i: (i, 0))] * 3,
        out_specs=pl.BlockSpec((tm, lane), lambda i: (i, 0)),
        compiler_params=pltpu.CompilerParams(dimension_semantics=("parallel",)),
        cost_estimate=pl.CostEstimate(flops=8 * n_pad,
                                      transcendentals=3 * n_pad,
                                      bytes_accessed=16 * n_pad),
    )(prep(x1), prep(x2), prep(x3))
    return out.reshape(-1)[:n].reshape(orig_shape)


# ---------------------------------------------------------------------------
# Kernel 2: fused Conv3x3 (pad=1, no bias) + GroupNorm + ReLU   (NHWC layout)
#   Takes a *list* of input slabs whose channels are logically concatenated,
#   so the torch.cat of (fused, x4) is fused into the first conv kernel.
# ---------------------------------------------------------------------------
def _make_conv_gn_relu_kernel(n_in, cins, H, W, cout, eps):
    def kernel(*refs):
        x_refs = refs[:n_in]
        w_ref, gmat_ref, gamma_ref, beta_ref, o_ref = refs[n_in:]

        gamma = gamma_ref[...]                                # (1, cout), hoisted
        beta = beta_ref[...]                                  # (1, cout)

        acc = jnp.zeros((H * W, cout), jnp.float32)
        c0 = 0
        for x_ref, cin in zip(x_refs, cins):
            x = x_ref[0].astype(jnp.float32)                  # (H+2, W+2, cin) padded
            for t in range(9):                                # 9-tap im2col matmuls (MXU)
                dh, dw = divmod(t, 3)
                patch = x[dh:dh + H, dw:dw + W, :].reshape(H * W, cin)
                acc = acc + jnp.dot(patch, w_ref[t, c0:c0 + cin, :],
                                    preferred_element_type=jnp.float32)
            c0 += cin

        # Fused GroupNorm (biased variance, eps inside rsqrt) + affine + ReLU.
        # Group statistics via a tiny group-averaging matmul: each channel gets
        # its group's mean / E[x^2] broadcast back per-channel (no lane reshapes).
        ssum = jnp.sum(acc, axis=0, keepdims=True)            # (1, cout)   XLU reduce
        sqsum = jnp.sum(acc * acc, axis=0, keepdims=True)     # (1, cout)
        gmean = jnp.dot(ssum, gmat_ref[...], preferred_element_type=jnp.float32)
        gmsq = jnp.dot(sqsum, gmat_ref[...], preferred_element_type=jnp.float32)
        inv = lax.rsqrt(gmsq - gmean * gmean + eps)           # EUP slot
        y = (acc - gmean) * inv * gamma + beta
        y = jnp.maximum(y, 0.0)
        o_ref[0] = y.reshape(H, W, cout).astype(o_ref.dtype)

    return kernel


def conv3x3_gn_relu(inputs, w, gamma, beta, num_groups, eps=EPS):
    """Fused 3x3 conv (padding=1, bias=False) + GroupNorm + ReLU on NHWC inputs.

    `inputs`: list of NHWC tensors treated as channel-concatenated (concat is fused).
    `w`: HWIO weights of shape (3, 3, sum(cin), cout).
    """
    B, H, W, _ = inputs[0].shape
    cins = tuple(int(x.shape[-1]) for x in inputs)
    cin_total = sum(cins)
    cout = int(w.shape[-1])
    assert w.shape == (3, 3, cin_total, cout)
    assert cout % num_groups == 0
    gsize = cout // num_groups

    # Group-averaging matrix: gmat[i, j] = 1/(H*W*gsize) iff channels i, j share a group.
    gids = jnp.arange(cout) // gsize
    gmat = (gids[:, None] == gids[None, :]).astype(jnp.float32) / float(H * W * gsize)

    padded = [jnp.pad(x, ((0, 0), (1, 1), (1, 1), (0, 0))) for x in inputs]
    w9 = w.reshape(9, cin_total, cout)
    gamma2 = gamma.reshape(1, cout).astype(jnp.float32)
    beta2 = beta.reshape(1, cout).astype(jnp.float32)

    in_specs = [pl.BlockSpec((1, H + 2, W + 2, c), lambda b: (b, 0, 0, 0)) for c in cins]
    in_specs += [
        pl.BlockSpec((9, cin_total, cout), lambda b: (0, 0, 0)),   # weights stay resident
        pl.BlockSpec((cout, cout), lambda b: (0, 0)),
        pl.BlockSpec((1, cout), lambda b: (0, 0)),
        pl.BlockSpec((1, cout), lambda b: (0, 0)),
    ]
    flops = 2 * B * H * W * 9 * cin_total * cout
    bytes_accessed = 4 * (sum(int(x.size) for x in padded) + int(w9.size) + B * H * W * cout)

    return pl.pallas_call(
        _make_conv_gn_relu_kernel(len(inputs), cins, H, W, cout, eps),
        out_shape=jax.ShapeDtypeStruct((B, H, W, cout), inputs[0].dtype),
        grid=(B,),                                             # per-image; sharded across TCs
        in_specs=in_specs,
        out_specs=pl.BlockSpec((1, H, W, cout), lambda b: (b, 0, 0, 0)),
        compiler_params=pltpu.CompilerParams(dimension_semantics=("parallel",)),
        cost_estimate=pl.CostEstimate(flops=flops, transcendentals=B * num_groups,
                                      bytes_accessed=bytes_accessed),
    )(*padded, w9, gmat, gamma2, beta2)


# ---------------------------------------------------------------------------
# Module: Fusion
# ---------------------------------------------------------------------------
class Fusion:
    """JAX/Pallas equivalent of the PyTorch Fusion module (NCHW interface)."""

    def __init__(self, in_channels, key):
        assert in_channels % 2 == 0
        mid = out = in_channels // 2
        self.num_groups = 32
        assert mid % self.num_groups == 0, "GroupNorm(32) needs (in_channels//2) % 32 == 0"
        k1, k2 = jax.random.split(key)
        # kaiming_normal_ (fan_in, ReLU gain), matching the PyTorch init; HWIO layout.
        std1 = (2.0 / (in_channels * 9)) ** 0.5
        std2 = (2.0 / (mid * 9)) ** 0.5
        self.w1 = jax.random.normal(k1, (3, 3, in_channels, mid), jnp.float32) * std1
        self.w2 = jax.random.normal(k2, (3, 3, mid, out), jnp.float32) * std2
        # GroupNorm affine params (PyTorch default: weight=1, bias=0).
        self.g1 = jnp.ones((mid,), jnp.float32)
        self.b1 = jnp.zeros((mid,), jnp.float32)
        self.g2 = jnp.ones((out,), jnp.float32)
        self.b2 = jnp.zeros((out,), jnp.float32)

    def __call__(self, x1, x2, x3, x4=None):
        fused = fusion_weighted_sum(x1, x2, x3)                 # NCHW
        if x4 is None:
            return fused
        # NCHW -> NHWC (channel-last == TPU lane axis); thin XLA glue only.
        fa = jnp.transpose(fused, (0, 2, 3, 1))
        fb = jnp.transpose(x4, (0, 2, 3, 1))
        # DoubleConv(in_channels -> in_channels//2); the channel concat is fused
        # into the first conv kernel (two input slabs, split weight rows).
        h = conv3x3_gn_relu([fa, fb], self.w1, self.g1, self.b1, self.num_groups)
        h = conv3x3_gn_relu([h], self.w2, self.g2, self.b2, self.num_groups)
        return jnp.transpose(h, (0, 3, 1, 2))                   # back to NCHW


# ---------------------------------------------------------------------------
# Pure-JAX reference (same math as the PyTorch module) + demo
# ---------------------------------------------------------------------------
def _ref_group_norm(y, gamma, beta, ng, eps=EPS):
    B, C, H, W = y.shape
    yg = y.reshape(B, ng, C // ng, H * W)
    mean = jnp.mean(yg, axis=(2, 3), keepdims=True)
    var = jnp.mean((yg - mean) ** 2, axis=(2, 3), keepdims=True)
    yn = ((yg - mean) / jnp.sqrt(var + eps)).reshape(B, C, H, W)
    return yn * gamma.reshape(1, C, 1, 1) + beta.reshape(1, C, 1, 1)


def _ref_conv(x, w_hwio):
    return lax.conv_general_dilated(
        x, w_hwio, window_strides=(1, 1), padding=((1, 1), (1, 1)),
        dimension_numbers=("NCHW", "HWIO", "NCHW"),
        precision=lax.Precision.HIGHEST)


if __name__ == "__main__":
    key = jax.random.PRNGKey(0)
    kx1, kx2, kx3, kx4, kmodel = jax.random.split(key, 5)

    # Small shapes consistent with the module: GroupNorm(32) needs in_channels//2 % 32 == 0.
    B, Hh, Ww = 2, 16, 16
    in_channels = 64                       # Fusion(in_channels); DoubleConv(64 -> 32)
    ch = in_channels // 2                  # x1/x2/x3 and x4 each carry half the channels

    x1 = jax.random.normal(kx1, (B, ch, Hh, Ww), jnp.float32)
    x2 = jax.random.normal(kx2, (B, ch, Hh, Ww), jnp.float32)
    x3 = jax.random.normal(kx3, (B, ch, Hh, Ww), jnp.float32)
    x4 = jax.random.normal(kx4, (B, ch, Hh, Ww), jnp.float32)

    model = Fusion(in_channels, kmodel)

    out_a = model(x1, x2, x3)              # x4 is None branch
    out_b = model(x1, x2, x3, x4)          # DoubleConv branch
    jax.block_until_ready((out_a, out_b))

    # Reference: weighted sum.
    e1, e2, e3 = jnp.exp(x1), jnp.exp(x2), jnp.exp(x3)
    den = e1 + e2 + e3
    fused_ref = (x1 * e1 + x2 * e2 + x3 * e3) / den

    # Reference: DoubleConv(cat([fused, x4], dim=1)).
    cat = jnp.concatenate([fused_ref, x4], axis=1)
    h_ref = jnp.maximum(_ref_group_norm(_ref_conv(cat, model.w1), model.g1, model.b1, 32), 0.0)
    ref_b = jnp.maximum(_ref_group_norm(_ref_conv(h_ref, model.w2), model.g2, model.b2, 32), 0.0)

    assert out_a.shape == (B, ch, Hh, Ww)
    assert out_b.shape == (B, in_channels // 2, Hh, Ww)
    err_a = float(jnp.max(jnp.abs(out_a - fused_ref)))
    err_b = float(jnp.max(jnp.abs(out_b - ref_b)))
    assert err_a < 1e-4, f"weighted-sum mismatch: {err_a}"
    assert err_b < 2e-3, f"DoubleConv branch mismatch: {err_b}"

    print("KERNEL_OK")
</pallas_src>

<mosaic_0001>
module attributes {stable_mosaic.version = 11 : i64} {
  func.func @_weighted_sum_kernel(%arg0: i32, %arg1: memref<32x512xf32, #tpu.memory_space<vmem>>, %arg2: memref<32x512xf32, #tpu.memory_space<vmem>>, %arg3: memref<32x512xf32, #tpu.memory_space<vmem>>, %arg4: memref<32x512xf32, #tpu.memory_space<vmem>>) attributes {dimension_semantics = [#tpu.dimension_semantics<parallel>], iteration_bounds = array<i64: 1>, scalar_prefetch = 0 : i64, scratch_operands = 0 : i64, tpu.core_type = #tpu.core_type<tc>, window_params = [{transform_indices = @transform_0, window_bounds = array<i64: 32, 512>}, {transform_indices = @transform_1, window_bounds = array<i64: 32, 512>}, {transform_indices = @transform_2, window_bounds = array<i64: 32, 512>}, {transform_indices = @transform_3, window_bounds = array<i64: 32, 512>}]} {
    %c0 = arith.constant 0 : index
    %c0_0 = arith.constant 0 : index
    %0 = vector.load %arg1[%c0, %c0_0] : memref<32x512xf32, #tpu.memory_space<vmem>>, vector<32x512xf32>
    %c0_1 = arith.constant 0 : index
    %c0_2 = arith.constant 0 : index
    %1 = vector.load %arg2[%c0_1, %c0_2] : memref<32x512xf32, #tpu.memory_space<vmem>>, vector<32x512xf32>
    %c0_3 = arith.constant 0 : index
    %c0_4 = arith.constant 0 : index
    %2 = vector.load %arg3[%c0_3, %c0_4] : memref<32x512xf32, #tpu.memory_space<vmem>>, vector<32x512xf32>
    %3 = math.exp %0 : vector<32x512xf32>
    %4 = math.exp %1 : vector<32x512xf32>
    %5 = math.exp %2 : vector<32x512xf32>
    %6 = arith.addf %3, %4 : vector<32x512xf32>
    %7 = arith.addf %6, %5 : vector<32x512xf32>
    %8 = tpu.reciprocal %7 : vector<32x512xf32> -> vector<32x512xf32>
    %9 = arith.mulf %0, %3 : vector<32x512xf32>
    %10 = arith.mulf %1, %4 : vector<32x512xf32>
    %11 = arith.addf %9, %10 : vector<32x512xf32>
    %12 = arith.mulf %2, %5 : vector<32x512xf32>
    %13 = arith.addf %11, %12 : vector<32x512xf32>
    %14 = arith.mulf %13, %8 : vector<32x512xf32>
    %c0_5 = arith.constant 0 : index
    %c0_6 = arith.constant 0 : index
    %15 = vector.load %arg4[%c0_5, %c0_6] : memref<32x512xf32, #tpu.memory_space<vmem>>, vector<32x512xf32>
    tpu.vector_store %arg4[%c0_5, %c0_6], %14 {strides = array<i32>} : memref<32x512xf32, #tpu.memory_space<vmem>>, vector<32x512xf32>,
    return
  }
  func.func @transform_0(%arg0: i32) -> (i32, i32) {
    %c0_i32 = arith.constant 0 : i32
    %c0_i32_0 = arith.constant 0 : i32
    return %arg0, %c0_i32 : i32, i32
  }
  func.func @transform_1(%arg0: i32) -> (i32, i32) {
    %c0_i32 = arith.constant 0 : i32
    %c0_i32_0 = arith.constant 0 : i32
    return %arg0, %c0_i32 : i32, i32
  }
  func.func @transform_2(%arg0: i32) -> (i32, i32) {
    %c0_i32 = arith.constant 0 : i32
    %c0_i32_0 = arith.constant 0 : i32
    return %arg0, %c0_i32 : i32, i32
  }
  func.func @transform_3(%arg0: i32) -> (i32, i32) {
    %c0_i32 = arith.constant 0 : i32
    %c0_i32_0 = arith.constant 0 : i32
    return %arg0, %c0_i32 : i32, i32
  }
}

</mosaic_0001>

<bundles_post_ra>
// kernel: tpu_custom_call.1
= control target key start
LH: loop header
LB: loop body
LE: loop exit
PB: predicated region body
PF: predicated region fallthrough
CT: control target
= control target key end

     0   :  { %8 = vsyncpa [#allocation3], 0  ;;  %s883_s0 = inlined_call_operand.hbm [shape: f32[32,512], index: 0, kind: input, shape index: {}]   ;;  %s884_s1 = inlined_call_operand.hbm [shape: f32[32,512], index: 1, kind: input, shape index: {}]   ;;  %s885_s2 = inlined_call_operand.hbm [shape: f32[32,512], index: 2, kind: input, shape index: {}]   ;;  %s886_s3 = inlined_call_operand.hbm [shape: f32[32,512], index: 3, kind: output, shape index: {}]  }
   0x1   :  { %9 = vsyncpa [#allocation6], 0 }
   0x2   :  { %10 = vsyncpa [#allocation4], 0  ;;  %s606_s12 = smov [#allocation5]   ;;  %s607_s14 = smov [#allocation2]  }
   0x3   :  { %s28_s13 = sshll.u32 %s606_s12, 4  ;;  %s16_s15 = sshll.u32 %s607_s14, 4  ;;  %s29_s13 = int_to_ptr.vmem [resolvable:$true] %s28_s13  ;;  %s632_s15 = int_to_ptr.vmem [resolvable:$true] %s16_s15 }
   0x4   :  { %s512_s18 = scalar_lea.hbm %s884_s1, 2048 }
   0x5   :  { %p513_p0 = scmp.ne.s32.totalorder %s884_s1, %s512_s18  ;;  %p516_p1 = scmp.lt.u32.totalorder %s512_s18, %s884_s1 }
   0x7   :  { %p518_p2 = pnand %p516_p1, %p513_p0 }
   0x9   :  { %521 = shalt.err (!%p518_p2)
}
   0xa   :  { %s522_s23 = scalar_lea.vmem %s29_s13, 2048  ;;  %p527_p4 = scmp.lt.s32.totalorder %s29_s13, %s29_s13 }
   0xb   :  { %p523_p3 = scmp.ne.s32.totalorder %s29_s13, %s522_s23  ;;  %p528_p5 = scmp.lt.s32.totalorder %s522_s23, %s522_s23 }
   0xd   :  { %p529_p6 = por %p528_p5, %p527_p4 }
   0xf   :  { %p530_p7 = pnand %p529_p6, %p523_p3 }
  0x11   :  { %533 = shalt.err (!%p530_p7)
}
  0x12   :  { %s608_s24 = smov 512   ;;  %s609_s25 = smov 32  }
  0x13   :  { %34 = dma.hbm_to_vmem [thread:$0]  %s884_s1, 2048, %s29_s13, [#allocation6], %s608_s24, %s608_s24, %s609_s25  }
  0x14   :  { %s534_s30 = scalar_lea.hbm %s883_s0, 2048 }
  0x15   :  { %p535_p8 = scmp.ne.s32.totalorder %s883_s0, %s534_s30  ;;  %p538_p9 = scmp.lt.u32.totalorder %s534_s30, %s883_s0 }
  0x17   :  { %p540_p10 = pnand %p538_p9, %p535_p8 }
  0x19   :  { %543 = shalt.err (!%p540_p10)
}
  0x1a   :  { %s544_s8 = scalar_lea.vmem %s632_s15, 2048  ;;  %p549_p12 = scmp.lt.s32.totalorder %s632_s15, %s632_s15 }
  0x1b   :  { %p545_p11 = scmp.ne.s32.totalorder %s632_s15, %s544_s8  ;;  %p550_p13 = scmp.lt.s32.totalorder %s544_s8, %s544_s8 }
  0x1d   :  { %p551_p0 = por %p550_p13, %p549_p12 }
  0x1f   :  { %p552_p1 = pnand %p551_p0, %p545_p11 }
  0x21   :  { %555 = shalt.err (!%p552_p1)
}
  0x22   :  { %22 = dma.hbm_to_vmem [thread:$0]  %s883_s0, 2048, %s632_s15, [#allocation3], %s608_s24, %s608_s24, %s609_s25  }
  0x23   :  { %s610_s10 = smov [#allocation7]   ;;  %s556_s14 = scalar_lea.hbm %s885_s2, 2048 }
  0x24   :  { %s40_s11 = sshll.u32 %s610_s10, 4  ;;  %p557_p2 = scmp.ne.s32.totalorder %s885_s2, %s556_s14  ;;  %s41_s11 = int_to_ptr.vmem [resolvable:$true] %s40_s11 }
  0x25   :  { %p560_p3 = scmp.lt.u32.totalorder %s556_s14, %s885_s2 }
  0x27   :  { %p562_p4 = pnand %p560_p3, %p557_p2 }
  0x29   :  { %565 = shalt.err (!%p562_p4)
}
  0x2a   :  { %s566_s20 = scalar_lea.vmem %s41_s11, 2048  ;;  %p571_p6 = scmp.lt.s32.totalorder %s41_s11, %s41_s11 }
  0x2b   :  { %p567_p5 = scmp.ne.s32.totalorder %s41_s11, %s566_s20  ;;  %p572_p7 = scmp.lt.s32.totalorder %s566_s20, %s566_s20 }
  0x2d   :  { %p573_p8 = por %p572_p7, %p571_p6 }
  0x2f   :  { %p574_p9 = pnand %p573_p8, %p567_p5 }
  0x31   :  { %577 = shalt.err (!%p574_p9)
}
  0x32   :  { %46 = dma.hbm_to_vmem [thread:$0]  %s885_s2, 2048, %s41_s11, [#allocation6], %s608_s24, %s608_s24, %s609_s25  }
  0x33   :  { %600 = dma.done.wait [#allocation3], 2048  }
  0x34   :  { %601 = vsyncadd [#allocation3], 4294965248 }
  0x35   :  { %602 = dma.done.wait [#allocation6], 4096  }
  0x36   :  { %603 = vsyncadd [#allocation6], 4294963200  ;;  %v56_v0 = vld [vmem:[#allocation2] sm:$0xff]  ;;  %v687_v6 = vld [vmem:[#allocation2 + $0x8] sm:$0xff]  ;;  %s611_s2 = smov [#allocation8]  }
  0x37   :  { %v72_v1 = vld [vmem:[#allocation5] sm:$0xff]  ;;  %v104_v3 = vmul.f32 1.442695, %v56_v0  ;;  %v689_v7 = vld [vmem:[#allocation5 + $0x8] sm:$0xff]  ;;  %v106_v9 = vmul.f32 1.442695, %v687_v6 }
  0x38   :  { %v684_v2 = vld [vmem:[#allocation7] sm:$0xff]  ;;  %v136_v4 = vmul.f32 1.442695, %v72_v1  ;;  %v691_v8 = vld [vmem:[#allocation7 + $0x8] sm:$0xff]  ;;  %v138_v10 = vmul.f32 1.442695, %v689_v7 }
  0x39   :  { %v168_v5 = vmul.f32 1.442695, %v684_v2  ;;  %384 = vpow2.f32 %v104_v3  ;;  %v170_v11 = vmul.f32 1.442695, %v691_v8  ;;  %v696_v12 = vld [vmem:[#allocation2 + $0x10] sm:$0xff]  ;;  %v704_v17 = vld [vmem:[#allocation2 + $0x18] sm:$0xff] }
  0x3a   :  { %386 = vpow2.f32 %v136_v4  ;;  %v698_v13 = vld [vmem:[#allocation5 + $0x10] sm:$0xff]  ;;  %v108_v15 = vmul.f32 1.442695, %v696_v12  ;;  %v706_v18 = vld [vmem:[#allocation5 + $0x18] sm:$0xff]  ;;  %v110_v21 = vmul.f32 1.442695, %v704_v17 }
  0x3b   :  { %v700_v14 = vld [vmem:[#allocation7 + $0x10] sm:$0xff]  ;;  %388 = vpow2.f32 %v168_v5  ;;  %v140_v16 = vmul.f32 1.442695, %v698_v13  ;;  %v709_v20 = vld [vmem:[#allocation7 + $0x18] sm:$0xff]  ;;  %v712_v22 = vld [vmem:[#allocation2 + $0x20] sm:$0xff]  ;;  %s365_s21 = sshll.u32 %s611_s2, 4  ;;  %s366_s21 = int_to_ptr.vmem [resolvable:$true] %s365_s21 }
  0x3c   :  { %390 = vpow2.f32 %v106_v9  ;;  %v172_v19 = vmul.f32 1.442695, %v700_v14  ;;  %v142_v23 = vmul.f32 1.442695, %v706_v18  ;;  %v715_v24 = vld [vmem:[#allocation5 + $0x20] sm:$0xff]  ;;  %v721_v28 = vld [vmem:[#allocation2 + $0x28] sm:$0xff]  ;;  %p583_p11 = scmp.lt.s32.totalorder %s366_s21, %s366_s21 }
  0x3d   :  { %392 = vpow2.f32 %v138_v10  ;;  %v174_v25 = vmul.f32 1.442695, %v709_v20  ;;  %v718_v26 = vld [vmem:[#allocation7 + $0x20] sm:$0xff]  ;;  %v112_v27 = vmul.f32 1.442695, %v712_v22  ;;  %v725_v32 = vld [vmem:[#allocation5 + $0x28] sm:$0xff] }
  0x3e   :  { %394 = vpow2.f32 %v170_v11  ;;  %v144_v29 = vmul.f32 1.442695, %v715_v24  ;;  %v176_v31 = vmul.f32 1.442695, %v718_v26  ;;  %v727_v34 = vld [vmem:[#allocation7 + $0x28] sm:$0xff]  ;;  %v731_v40 = vld [vmem:[#allocation2 + $0x30] sm:$0xff] }
  0x3f   :  { %396 = vpow2.f32 %v108_v15  ;;  %v114_v35 = vmul.f32 1.442695, %v721_v28  ;;  %v146_v39 = vmul.f32 1.442695, %v725_v32  ;;  %v178_v43 = vmul.f32 1.442695, %v727_v34 }
  0x40   :  { %398 = vpow2.f32 %v140_v16  ;;  %v734_v44 = vld [vmem:[#allocation5 + $0x30] sm:$0xff]  ;;  %v116_v51 = vmul.f32 1.442695, %v731_v40  ;;  %v739_v52 = vld [vmem:[#allocation2 + $0x38] sm:$0xff]  ;;  %v751_v4 = vld [vmem:[#allocation2 + $0x40] sm:$0xff]  ;;  %s578_s22 = scalar_lea.vmem %s366_s21, 2048 }
  0x41   :  { %400 = vpow2.f32 %v172_v19  ;;  %v736_v45 = vld [vmem:[#allocation7 + $0x30] sm:$0xff]  ;;  %v148_v55 = vmul.f32 1.442695, %v734_v44  ;;  %v743_v57 = vld [vmem:[#allocation5 + $0x38] sm:$0xff]  ;;  %v118_v3 = vmul.f32 1.442695, %v739_v52  ;;  %p579_p10 = scmp.ne.s32.totalorder %s366_s21, %s578_s22  ;;  %p584_p12 = scmp.lt.s32.totalorder %s578_s22, %s578_s22 }
  0x42   :  { %402 = vpow2.f32 %v110_v21  ;;  %v180_v56 = vmul.f32 1.442695, %v736_v45  ;;  %v745_v58 = vld [vmem:[#allocation7 + $0x38] sm:$0xff]  ;;  %v150_v10 = vmul.f32 1.442695, %v743_v57  ;;  %v755_v11 = vld [vmem:[#allocation5 + $0x40] sm:$0xff] }
  0x43   :  { %v385_v30 = vpop.eup %384  ;;  %404 = vpow2.f32 %v142_v23  ;;  %p585_p13 = por %p584_p12, %p583_p11 }
  0x44   :  { %v387_v33 = vpop.eup %386  ;;  %406 = vpow2.f32 %v174_v25  ;;  %v248_v47 = vmul.f32 %v385_v30, %v56_v0  ;;  %v760_v25 = vld [vmem:[#allocation7 + $0x40] sm:$0xff] }
  0x45   :  { %v389_v36 = vpop.eup %388  ;;  %v200_v37 = vadd.f32 %v387_v33, %v385_v30  ;;  %408 = vpow2.f32 %v112_v27  ;;  %v264_v48 = vmul.f32 %v387_v33, %v72_v1  ;;  %v120_v27 = vmul.f32 1.442695, %v751_v4  ;;  %p586_p0 = pnand %p585_p13, %p579_p10 }
  0x46   :  { %v391_v38 = vpop.eup %390  ;;  %410 = vpow2.f32 %v144_v29  ;;  %v296_v1 = vmul.f32 %v389_v36, %v684_v2  ;;  %v152_v33 = vmul.f32 1.442695, %v755_v11 }
  0x47   :  { %v393_v41 = vpop.eup %392  ;;  %v216_v42 = vadd.f32 %v389_v36, %v200_v37  ;;  %412 = vpow2.f32 %v176_v31  ;;  %v249_v60 = vmul.f32 %v391_v38, %v687_v6  ;;  %v280_v0 = vadd.f32 %v264_v48, %v248_v47  ;;  %v770_v47 = vld [vmem:[#allocation5 + $0x48] sm:$0xff] }
  0x48   :  { %v395_v46 = vpop.eup %394  ;;  %v201_v49 = vadd.f32 %v393_v41, %v391_v38  ;;  %414 = vpow2.f32 %v114_v35  ;;  %v265_v61 = vmul.f32 %v393_v41, %v689_v7  ;;  %v182_v6 = vmul.f32 1.442695, %v745_v58  ;;  %v772_v48 = vld [vmem:[#allocation7 + $0x48] sm:$0xff] }
  0x49   :  { %v397_v50 = vpop.eup %396  ;;  %416 = vrcp.f32 %v216_v42  ;;  %v297_v23 = vmul.f32 %v395_v46, %v691_v8  ;;  %v312_v30 = vadd.f32 %v296_v1, %v280_v0  ;;  %v184_v41 = vmul.f32 1.442695, %v760_v25  ;;  %v783_v1 = vld [vmem:[#allocation5 + $0x50] sm:$0xff] }
  0x4a   :  { %v399_v53 = vpop.eup %398  ;;  %v217_v54 = vadd.f32 %v395_v46, %v201_v49  ;;  %418 = vpow2.f32 %v146_v39  ;;  %v250_v15 = vmul.f32 %v397_v50, %v696_v12  ;;  %v281_v21 = vadd.f32 %v265_v61, %v249_v60  ;;  %v764_v12 = vld [vmem:[#allocation2 + $0x48] sm:$0xff] }
  0x4b   :  { %v401_v59 = vpop.eup %400  ;;  %v202_v62 = vadd.f32 %v399_v53, %v397_v50  ;;  %420 = vpow2.f32 %v178_v43  ;;  %v266_v16 = vmul.f32 %v399_v53, %v698_v13  ;;  %v154_v60 = vmul.f32 1.442695, %v770_v47 }
  0x4c   :  { %v403_v63 = vpop.eup %402  ;;  %422 = vrcp.f32 %v217_v54  ;;  %v298_v39 = vmul.f32 %v401_v59, %v700_v14  ;;  %v313_v43 = vadd.f32 %v297_v23, %v281_v21  ;;  %v186_v61 = vmul.f32 1.442695, %v772_v48  ;;  %v792_v23 = vld [vmem:[#allocation2 + $0x58] sm:$0xff] }
  0x4d   :  { %v405_v5 = vpop.eup %404  ;;  %v218_v9 = vadd.f32 %v401_v59, %v202_v62  ;;  %424 = vpow2.f32 %v116_v51  ;;  %v251_v35 = vmul.f32 %v403_v63, %v704_v17  ;;  %v282_v38 = vadd.f32 %v266_v16, %v250_v15  ;;  %v780_v62 = vld [vmem:[#allocation2 + $0x50] sm:$0xff] }
  0x4e   :  { %v407_v7 = vpop.eup %406  ;;  %v203_v2 = vadd.f32 %v405_v5, %v403_v63  ;;  %426 = vpow2.f32 %v148_v55  ;;  %v267_v36 = vmul.f32 %v405_v5, %v706_v18  ;;  %v122_v17 = vmul.f32 1.442695, %v764_v12 }
  0x4f   :  { %v409_v19 = vpop.eup %408  ;;  %428 = vrcp.f32 %v218_v9  ;;  %v299_v54 = vmul.f32 %v407_v7, %v709_v20  ;;  %v314_v59 = vadd.f32 %v298_v39, %v282_v38  ;;  %v785_v20 = vld [vmem:[#allocation7 + $0x50] sm:$0xff]  ;;  %v126_v38 = vmul.f32 1.442695, %v792_v23 }
  0x50   :  { %v411_v29 = vpop.eup %410  ;;  %v219_v31 = vadd.f32 %v407_v7, %v203_v2  ;;  %430 = vpow2.f32 %v180_v56  ;;  %v252_v50 = vmul.f32 %v409_v19, %v712_v22  ;;  %v283_v53 = vadd.f32 %v267_v36, %v251_v35  ;;  %v799_v36 = vld [vmem:[#allocation7 + $0x58] sm:$0xff] }
  0x51   :  { %v413_v13 = vpop.eup %412  ;;  %v204_v37 = vadd.f32 %v411_v29, %v409_v19  ;;  %432 = vpow2.f32 %v118_v3  ;;  %v268_v51 = vmul.f32 %v411_v29, %v715_v24  ;;  %v156_v19 = vmul.f32 1.442695, %v783_v1 }
  0x52   :  { %v415_v8 = vpop.eup %414  ;;  %434 = vrcp.f32 %v219_v31  ;;  %v300_v24 = vmul.f32 %v413_v13, %v718_v26  ;;  %v315_v7 = vadd.f32 %v299_v54, %v283_v53  ;;  %v124_v26 = vmul.f32 1.442695, %v780_v62  ;;  %v811_v53 = vld [vmem:[#allocation2 + $0x68] sm:$0xff] }
  0x53   :  { %v417_v42 = vpop.eup %416  ;;  %v220_v46 = vadd.f32 %v413_v13, %v204_v37  ;;  %436 = vpow2.f32 %v150_v10  ;;  %v284_v5 = vadd.f32 %v268_v51, %v252_v50  ;;  %v253_v9 = vmul.f32 %v415_v8, %v721_v28 }
  0x54   :  { %v419_v18 = vpop.eup %418  ;;  %v328_v49 = vmul.f32 %v417_v42, %v312_v30  ;;  %438 = vpow2.f32 %v182_v6  ;;  %v188_v21 = vmul.f32 1.442695, %v785_v20  ;;  %v796_v30 = vld [vmem:[#allocation5 + $0x58] sm:$0xff] }
  0x55   :  { %v421_v14 = vpop.eup %420  ;;  %440 = vrcp.f32 %v220_v46  ;;  %v205_v55 = vadd.f32 %v419_v18, %v415_v8  ;;  %v269_v10 = vmul.f32 %v419_v18, %v725_v32  ;;  %v190_v46 = vmul.f32 1.442695, %v799_v36 }
  0x56   :  { %v423_v56 = vpop.eup %422  ;;  %344 = vst [vmem:[#allocation8] sm:$0xff] %v328_v49  ;;  %442 = vpow2.f32 %v120_v27  ;;  %v301_v35 = vmul.f32 %v421_v14, %v727_v34 }
  0x57   :  { %v425_v22 = vpop.eup %424  ;;  %v329_v63 = vmul.f32 %v423_v56, %v313_v43  ;;  %v221_v0 = vadd.f32 %v421_v14, %v205_v55  ;;  %444 = vpow2.f32 %v152_v33  ;;  %v316_v33 = vadd.f32 %v300_v24, %v284_v5  ;;  %v809_v14 = vld [vmem:[#allocation7 + $0x60] sm:$0xff] }
  0x58   :  { %v427_v3 = vpop.eup %426  ;;  %446 = vpow2.f32 %v184_v41  ;;  %v254_v32 = vmul.f32 %v425_v22, %v731_v40  ;;  %v285_v13 = vadd.f32 %v269_v10, %v253_v9  ;;  %v803_v41 = vld [vmem:[#allocation2 + $0x60] sm:$0xff]  ;;  %v192_v24 = vmul.f32 1.442695, %v809_v14  ;;  %v822_v10 = vld [vmem:[#allocation7 + $0x68] sm:$0xff] }
  0x59   :  { %v429_v6 = vpop.eup %428  ;;  %345 = vst [vmem:[#allocation8 + $0x8] sm:$0xff] %v329_v63  ;;  %448 = vrcp.f32 %v221_v0  ;;  %v206_v15 = vadd.f32 %v427_v3, %v425_v22  ;;  %v270_v29 = vmul.f32 %v427_v3, %v734_v44  ;;  %v158_v44 = vmul.f32 1.442695, %v796_v30  ;;  %v818_v0 = vld [vmem:[#allocation5 + $0x68] sm:$0xff] }
  0x5a   :  { %v431_v16 = vpop.eup %430  ;;  %v330_v2 = vmul.f32 %v429_v6, %v314_v59  ;;  %450 = vpow2.f32 %v122_v17  ;;  %v807_v17 = vld [vmem:[#allocation5 + $0x60] sm:$0xff]  ;;  %v317_v50 = vadd.f32 %v301_v35, %v285_v13 }
  0x5b   :  { %v433_v28 = vpop.eup %432  ;;  %v222_v27 = vadd.f32 %v431_v16, %v206_v15  ;;  %452 = vpow2.f32 %v154_v60  ;;  %v286_v43 = vadd.f32 %v270_v29, %v254_v32  ;;  %v302_v34 = vmul.f32 %v431_v16, %v736_v45  ;;  %v826_v16 = vld [vmem:[#allocation2 + $0x70] sm:$0xff] }
  0x5c   :  { %v435_v31 = vpop.eup %434  ;;  %346 = vst [vmem:[#allocation8 + $0x10] sm:$0xff] %v330_v2  ;;  %454 = vpow2.f32 %v186_v61  ;;  %v255_v55 = vmul.f32 %v433_v28, %v739_v52  ;;  %v128_v45 = vmul.f32 1.442695, %v803_v41  ;;  %v160_v61 = vmul.f32 1.442695, %v807_v17 }
  0x5d   :  { %v437_v37 = vpop.eup %436  ;;  %v331_v8 = vmul.f32 %v435_v31, %v315_v7  ;;  %456 = vrcp.f32 %v222_v27  ;;  %v318_v63 = vadd.f32 %v302_v34, %v286_v43  ;;  %v130_v52 = vmul.f32 1.442695, %v811_v53 }
  0x5e   :  { %v439_v40 = vpop.eup %438  ;;  %v207_v39 = vadd.f32 %v437_v37, %v433_v28  ;;  %458 = vpow2.f32 %v124_v26  ;;  %v271_v56 = vmul.f32 %v437_v37, %v743_v57  ;;  %v194_v32 = vmul.f32 1.442695, %v822_v10 }
  0x5f   :  { %v441_v42 = vpop.eup %440  ;;  %347 = vst [vmem:[#allocation8 + $0x18] sm:$0xff] %v331_v8  ;;  %460 = vpow2.f32 %v156_v19  ;;  %v303_v5 = vmul.f32 %v439_v40, %v745_v58  ;;  %v132_v13 = vmul.f32 1.442695, %v826_v16 }
  0x60   :  { %v443_v18 = vpop.eup %442  ;;  %v332_v49 = vmul.f32 %v441_v42, %v316_v33  ;;  %v223_v51 = vadd.f32 %v439_v40, %v207_v39  ;;  %462 = vpow2.f32 %v188_v21  ;;  %v287_v7 = vadd.f32 %v271_v56, %v255_v55  ;;  %v834_v33 = vld [vmem:[#allocation7 + $0x70] sm:$0xff]  ;;  %v839_v39 = vld [vmem:[#allocation2 + $0x78] sm:$0xff] }
  0x61   :  { %v445_v54 = vpop.eup %444  ;;  %464 = vpow2.f32 %v126_v38  ;;  %v256_v15 = vmul.f32 %v443_v18, %v751_v4  ;;  %v162_v21 = vmul.f32 1.442695, %v818_v0  ;;  %v832_v4 = vld [vmem:[#allocation5 + $0x70] sm:$0xff]  ;;  %v196_v34 = vmul.f32 1.442695, %v834_v33 }
  0x62   :  { %v447_v59 = vpop.eup %446  ;;  %348 = vst [vmem:[#allocation8 + $0x20] sm:$0xff] %v332_v49  ;;  %466 = vrcp.f32 %v223_v51  ;;  %v208_v60 = vadd.f32 %v445_v54, %v443_v18  ;;  %v272_v26 = vmul.f32 %v445_v54, %v755_v11  ;;  %v319_v37 = vadd.f32 %v303_v5, %v287_v7  ;;  %v847_v51 = vld [vmem:[#allocation7 + $0x78] sm:$0xff] }
  0x63   :  { %v449_v22 = vpop.eup %448  ;;  %468 = vpow2.f32 %v158_v44  ;;  %v164_v40 = vmul.f32 1.442695, %v832_v4 }
  0x64   :  { %v451_v3 = vpop.eup %450  ;;  %v333_v57 = vmul.f32 %v449_v22, %v317_v50  ;;  %v224_v9 = vadd.f32 %v447_v59, %v208_v60  ;;  %470 = vpow2.f32 %v190_v46  ;;  %v288_v8 = vadd.f32 %v272_v26, %v256_v15  ;;  %v845_v50 = vld [vmem:[#allocation5 + $0x78] sm:$0xff] }
  0x65   :  { %v453_v6 = vpop.eup %452  ;;  %472 = vpow2.f32 %v128_v45  ;;  %v257_v28 = vmul.f32 %v451_v3, %v764_v12  ;;  %v304_v12 = vmul.f32 %v447_v59, %v760_v25 }
  0x66   :  { %v455_v2 = vpop.eup %454  ;;  %349 = vst [vmem:[#allocation8 + $0x28] sm:$0xff] %v333_v57  ;;  %474 = vrcp.f32 %v224_v9  ;;  %v209_v19 = vadd.f32 %v453_v6, %v451_v3  ;;  %v273_v27 = vmul.f32 %v453_v6, %v770_v47 }
  0x67   :  { %v457_v58 = vpop.eup %456  ;;  %476 = vpow2.f32 %v160_v61  ;;  %v305_v43 = vmul.f32 %v455_v2, %v772_v48  ;;  %v320_v56 = vadd.f32 %v304_v12, %v288_v8  ;;  %v134_v48 = vmul.f32 1.442695, %v839_v39 }
  0x68   :  { %v459_v11 = vpop.eup %458  ;;  %v334_v29 = vmul.f32 %v457_v58, %v318_v63  ;;  %v225_v31 = vadd.f32 %v455_v2, %v209_v19  ;;  %478 = vpow2.f32 %v192_v24  ;;  %v289_v42 = vadd.f32 %v273_v27, %v257_v28 }
  0x69   :  { %v461_v35 = vpop.eup %460  ;;  %480 = vpow2.f32 %v130_v52  ;;  %v258_v25 = vmul.f32 %v459_v11, %v780_v62  ;;  %v166_v62 = vmul.f32 1.442695, %v845_v50 }
  0x6a   :  { %v463_v47 = vpop.eup %462  ;;  %350 = vst [vmem:[#allocation8 + $0x30] sm:$0xff] %v334_v29  ;;  %482 = vrcp.f32 %v225_v31  ;;  %v210_v38 = vadd.f32 %v461_v35, %v459_v11  ;;  %v274_v49 = vmul.f32 %v461_v35, %v783_v1  ;;  %v321_v61 = vadd.f32 %v305_v43, %v289_v42 }
  0x6b   :  { %v465_v44 = vpop.eup %464  ;;  %484 = vpow2.f32 %v162_v21  ;;  %v198_v1 = vmul.f32 1.442695, %v847_v51  ;;  %v306_v24 = vmul.f32 %v463_v47, %v785_v20 }
  0x6c   :  { %v467_v46 = vpop.eup %466  ;;  %v226_v18 = vadd.f32 %v463_v47, %v210_v38  ;;  %486 = vpow2.f32 %v194_v32  ;;  %v290_v63 = vadd.f32 %v274_v49, %v258_v25  ;;  %v259_v5 = vmul.f32 %v465_v44, %v792_v23 }
  0x6d   :  { %v469_v54 = vpop.eup %468  ;;  %v335_v55 = vmul.f32 %v467_v46, %v319_v37  ;;  %488 = vpow2.f32 %v132_v13 }
  0x6e   :  { %v471_v45 = vpop.eup %470  ;;  %490 = vrcp.f32 %v226_v18  ;;  %v211_v59 = vadd.f32 %v469_v54, %v465_v44  ;;  %v275_v9 = vmul.f32 %v469_v54, %v796_v30  ;;  %v322_v2 = vadd.f32 %v306_v24, %v290_v63 }
  0x6f   :  { %v473_v60 = vpop.eup %472  ;;  %351 = vst [vmem:[#allocation8 + $0x38] sm:$0xff] %v335_v55  ;;  %492 = vpow2.f32 %v164_v40  ;;  %v307_v19 = vmul.f32 %v471_v45, %v799_v36 }
  0x70   :  { %v475_v22 = vpop.eup %474  ;;  %v227_v52 = vadd.f32 %v471_v45, %v211_v59  ;;  %494 = vpow2.f32 %v196_v34  ;;  %v291_v28 = vadd.f32 %v275_v9, %v259_v5  ;;  %v260_v23 = vmul.f32 %v473_v60, %v803_v41 }
  0x71   :  { %v477_v3 = vpop.eup %476  ;;  %v336_v57 = vmul.f32 %v475_v22, %v320_v56  ;;  %496 = vpow2.f32 %v134_v48 }
  0x72   :  { %v479_v6 = vpop.eup %478  ;;  %498 = vrcp.f32 %v227_v52  ;;  %v212_v7 = vadd.f32 %v477_v3, %v473_v60  ;;  %v276_v30 = vmul.f32 %v477_v3, %v807_v17  ;;  %v323_v8 = vadd.f32 %v307_v19, %v291_v28 }
  0x73   :  { %v481_v15 = vpop.eup %480  ;;  %352 = vst [vmem:[#allocation8 + $0x40] sm:$0xff] %v336_v57  ;;  %500 = vpow2.f32 %v166_v62  ;;  %v308_v47 = vmul.f32 %v479_v6, %v809_v14 }
  0x74   :  { %v483_v26 = vpop.eup %482  ;;  %v228_v20 = vadd.f32 %v479_v6, %v212_v7  ;;  %502 = vpow2.f32 %v198_v1  ;;  %v261_v13 = vmul.f32 %v481_v15, %v811_v53  ;;  %v292_v12 = vadd.f32 %v276_v30, %v260_v23 }
  0x75   :  { %v485_v21 = vpop.eup %484  ;;  %v337_v58 = vmul.f32 %v483_v26, %v321_v61 }
  0x76   :  { %v487_v27 = vpop.eup %486  ;;  %504 = vrcp.f32 %v228_v20  ;;  %v213_v32 = vadd.f32 %v485_v21, %v481_v15  ;;  %v277_v36 = vmul.f32 %v485_v21, %v818_v0  ;;  %v324_v46 = vadd.f32 %v308_v47, %v292_v12 }
  0x77   :  { %v489_v11 = vpop.eup %488  ;;  %353 = vst [vmem:[#allocation8 + $0x48] sm:$0xff] %v337_v58  ;;  %v309_v42 = vmul.f32 %v487_v27, %v822_v10 }
  0x78   :  { %v491_v29 = vpop.eup %490  ;;  %v229_v31 = vadd.f32 %v487_v27, %v213_v32  ;;  %v293_v44 = vadd.f32 %v277_v36, %v261_v13  ;;  %v262_v0 = vmul.f32 %v489_v11, %v826_v16 }
  0x79   :  { %v493_v35 = vpop.eup %492  ;;  %v338_v37 = vmul.f32 %v491_v29, %v322_v2 }
  0x7a   :  { %v495_v41 = vpop.eup %494  ;;  %506 = vrcp.f32 %v229_v31  ;;  %v214_v17 = vadd.f32 %v493_v35, %v489_v11  ;;  %v278_v18 = vmul.f32 %v493_v35, %v832_v4  ;;  %v325_v54 = vadd.f32 %v309_v42, %v293_v44 }
  0x7b   :  { %v497_v38 = vpop.eup %496  ;;  %354 = vst [vmem:[#allocation8 + $0x50] sm:$0xff] %v338_v37  ;;  %v310_v55 = vmul.f32 %v495_v41, %v834_v33 }
  0x7c   :  { %v499_v40 = vpop.eup %498  ;;  %v230_v43 = vadd.f32 %v495_v41, %v214_v17  ;;  %v294_v45 = vadd.f32 %v278_v18, %v262_v0  ;;  %v263_v10 = vmul.f32 %v497_v38, %v839_v39 }
  0x7d   :  { %v501_v34 = vpop.eup %500  ;;  %v339_v53 = vmul.f32 %v499_v40, %v323_v8 }
  0x7e   :  { %v503_v25 = vpop.eup %502  ;;  %508 = vrcp.f32 %v230_v43  ;;  %v215_v14 = vadd.f32 %v501_v34, %v497_v38  ;;  %v279_v59 = vmul.f32 %v501_v34, %v845_v50  ;;  %v326_v4 = vadd.f32 %v310_v55, %v294_v45 }
  0x7f   :  { %355 = vst [vmem:[#allocation8 + $0x58] sm:$0xff] %v339_v53  ;;  %v311_v62 = vmul.f32 %v503_v25, %v847_v51 }
  0x80   :  { %v505_v49 = vpop.eup %504  ;;  %v231_v56 = vadd.f32 %v503_v25, %v215_v14  ;;  %v295_v61 = vadd.f32 %v279_v59, %v263_v10 }
  0x81   :  { %v340_v48 = vmul.f32 %v505_v49, %v324_v46 }
  0x82   :  { %510 = vrcp.f32 %v231_v56  ;;  %v327_v63 = vadd.f32 %v311_v62, %v295_v61 }
  0x83   :  { %356 = vst [vmem:[#allocation8 + $0x60] sm:$0xff] %v340_v48 }
  0x84   :  { %v507_v16 = vpop.eup %506 }
  0x85   :  { %v341_v60 = vmul.f32 %v507_v16, %v325_v54 }
  0x87   :  { %357 = vst [vmem:[#allocation8 + $0x68] sm:$0xff] %v341_v60 }
  0x88   :  { %v509_v1 = vpop.eup %508 }
  0x89   :  { %v342_v22 = vmul.f32 %v509_v1, %v326_v4 }
  0x8b   :  { %358 = vst [vmem:[#allocation8 + $0x70] sm:$0xff] %v342_v22 }
  0x8c   :  { %v511_v33 = vpop.eup %510 }
  0x8d   :  { %v343_v24 = vmul.f32 %v511_v33, %v327_v63 }
  0x8f   :  { %359 = vst [vmem:[#allocation8 + $0x78] sm:$0xff] %v343_v24 }
  0x90   :  { %589 = shalt.err (!%p586_p0)
}
  0x91   :  { %s590_s27 = scalar_lea.hbm %s886_s3, 2048 }
  0x92   :  { %p591_p1 = scmp.ne.s32.totalorder %s886_s3, %s590_s27  ;;  %p594_p2 = scmp.lt.u32.totalorder %s590_s27, %s886_s3 }
  0x94   :  { %p596_p3 = pnand %p594_p2, %p591_p1 }
  0x96   :  { %599 = shalt.err (!%p596_p3)
}
  0x97   :  { %371 = dma.vmem_to_hbm [thread:$0]  %s366_s21, 2048, %s886_s3, [#allocation4], %s608_s24, %s608_s24, %s609_s25  }
  0x98   :  { %604 = dma.done.wait [#allocation4], 2048  }
  0x99   :  { %605 = vsyncadd [#allocation4], 4294965248 }
  0x9a   :  { %375 = vsyncpa [#allocation3], 1 }
  0x9b   :  { %376 = vsyncpa [#allocation6], 1 }
  0x9c   :  { %377 = vsyncpa [#allocation4], 1 }

</bundles_post_ra>
